<compile_context>
chip_gen: v6e
topology: v6e:2x2x1
jax: 0.10.0
libtpu: 0.0.40
codegen_flags: <defaults>
</compile_context>

<pallas_src>
import math

import jax
import jax.numpy as jnp
from jax import lax
from jax.experimental import pallas as pl
from jax.experimental.pallas import tpu as pltpu


def _make_mha_kernel(h, d_model, matmul_dtype):
    d_k = d_model // h
    scale = 1.0 / math.sqrt(d_k)

    def cast(x):
        return x if matmul_dtype is None else x.astype(matmul_dtype)

    def mha_kernel(q_ref, k_ref, v_ref, mask_ref,
                   wq_ref, bq_ref, wk_ref, bk_ref, wv_ref, bv_ref,
                   wo_ref, bo_ref, o_ref):
        # Block shapes:
        #   q_ref   : (1, TQ, D)      k_ref/v_ref : (1, S, D)
        #   mask_ref: (1, TQ, S)      o_ref       : (1, TQ, D)
        #   wq/wk/wv: (h, D, d_k)     bq/bk/bv    : (h, 1, d_k)
        #   wo      : (h, d_k, D)     bo          : (1, D)
        tq = q_ref.shape[1]

        q_in = cast(q_ref[0])
        k_in = cast(k_ref[0])
        v_in = cast(v_ref[0])

        # Hoisted mask predicate: one int8 -> f32 convert + compare per grid
        # step, reused by every head (the per-head op is a single select).
        mvals = mask_ref[0]
        if mvals.dtype != jnp.float32:
            mvals = mvals.astype(jnp.float32)
        neg_mask = mvals == jnp.float32(0.0)          # (TQ, S) bool

        out = jnp.zeros((tq, d_model), jnp.float32)

        for hd in range(h):
            # Per-head projections (f32 accumulation on the MXU).
            qh = (jnp.dot(q_in, cast(wq_ref[hd]),
                          preferred_element_type=jnp.float32)
                  + bq_ref[hd]) * scale                      # (TQ, d_k)
            kh = (jnp.dot(k_in, cast(wk_ref[hd]),
                          preferred_element_type=jnp.float32)
                  + bk_ref[hd])                              # (S, d_k)
            vh = (jnp.dot(v_in, cast(wv_ref[hd]),
                          preferred_element_type=jnp.float32)
                  + bv_ref[hd])                              # (S, d_k)

            # Scores: NT matmul contracting on d_k -- no transpose.
            s = lax.dot_general(cast(qh), cast(kh),
                                dimension_numbers=(((1,), (1,)), ((), ())),
                                preferred_element_type=jnp.float32)  # (TQ, S)
            s = jnp.where(neg_mask, jnp.float32(-1e9), s)

            # Numerically stable softmax over keys (f32 throughout).
            s = s - jnp.max(s, axis=-1, keepdims=True)
            p = jnp.exp(s)
            p = p * pl.reciprocal(jnp.sum(p, axis=-1, keepdims=True),
                                  approx=True)

            ctx = jnp.dot(cast(p), cast(vh),
                          preferred_element_type=jnp.float32)        # (TQ, d_k)

            # Accumulate this head directly into the output projection
            # (replaces concatenate + one big matmul; mathematically equal).
            out = out + jnp.dot(cast(ctx), cast(wo_ref[hd]),
                                preferred_element_type=jnp.float32)

        out = out + bo_ref[...]
        o_ref[0] = out.astype(o_ref.dtype)

    return mha_kernel


def multi_head_attention(query, key, value, mask, params, *, h,
                         q_block=None, matmul_dtype=None):
    """query: [B, Sq, D]; key/value: [B, Skv, D]; mask: [B, Sq, Skv] (0 = masked).

    params: wq/wk/wv/wo stored [in, out] (PyTorch nn.Linear transposed),
            bq/bk/bv/bo stored [1, out].
    """
    B, Sq, D = query.shape
    _, Skv, _ = key.shape
    assert D % h == 0
    d_k = D // h

    if mask is None:
        mask = jnp.ones((B, Sq, Skv), jnp.int8)     # attend everywhere

    # Query-tile selection (whole sequence when small; multiple of 8 otherwise).
    if q_block is None:
        q_block = Sq if Sq <= 512 else (512 if Sq % 512 == 0 else Sq)
    assert Sq % q_block == 0
    if q_block != Sq:
        assert q_block % 8 == 0, "query tile must be sublane-aligned"
    n_q = Sq // q_block

    # Pre-split weights per head outside the kernel (one-time, D*D-sized).
    def split_in(w):                      # (D, D) -> (h, D, d_k)
        return w.reshape(D, h, d_k).transpose(1, 0, 2)

    def split_b(b):                       # (1, D) -> (h, 1, d_k)
        return b.reshape(1, h, d_k).transpose(1, 0, 2)

    wq_h, wk_h, wv_h = (split_in(params[k]) for k in ("wq", "wk", "wv"))
    bq_h, bk_h, bv_h = (split_b(params[k]) for k in ("bq", "bk", "bv"))
    wo_h = params["wo"].reshape(h, d_k, D)
    bo = params["bo"]

    kernel = _make_mha_kernel(h, D, matmul_dtype)

    q_spec = pl.BlockSpec((1, q_block, D), lambda b, qi: (b, qi, 0))
    kv_spec = pl.BlockSpec((1, Skv, D), lambda b, qi: (b, 0, 0))
    mask_spec = pl.BlockSpec((1, q_block, Skv), lambda b, qi: (b, qi, 0))
    w_in_spec = pl.BlockSpec((h, D, d_k), lambda b, qi: (0, 0, 0))
    b_in_spec = pl.BlockSpec((h, 1, d_k), lambda b, qi: (0, 0, 0))
    wo_spec = pl.BlockSpec((h, d_k, D), lambda b, qi: (0, 0, 0))
    bo_spec = pl.BlockSpec((1, D), lambda b, qi: (0, 0))

    # Cost estimate so XLA can schedule around this custom call.
    flops = (2 * B * Sq * D * D                   # Q projection
             + 2 * 2 * B * n_q * Skv * D * D      # K, V projections (per q-tile)
             + 2 * B * Sq * Skv * D               # Q K^T
             + 2 * B * Sq * Skv * D               # P V
             + 2 * B * Sq * D * D)                # output projection
    transcendentals = B * h * Sq * Skv
    w_bytes = (4 * D * D + 4 * D) * params["wq"].dtype.itemsize
    bytes_accessed = (query.size * query.dtype.itemsize
                      + key.size * key.dtype.itemsize
                      + value.size * value.dtype.itemsize
                      + mask.size * mask.dtype.itemsize
                      + w_bytes
                      + B * Sq * D * query.dtype.itemsize)
    cost = pl.CostEstimate(flops=int(flops),
                           transcendentals=int(transcendentals),
                           bytes_accessed=int(bytes_accessed))

    # Rough per-step VMEM footprint (double-buffered I/O + f32 temporaries),
    # clamped so it is safe on v7x's smaller physical VMEM.
    itm = query.dtype.itemsize
    block_io = (2 * q_block * D * itm + 2 * Skv * D * itm
                + q_block * Skv * mask.dtype.itemsize + w_bytes)
    temps = 4 * (2 * q_block * Skv + 2 * q_block * D + 3 * max(q_block, Skv) * d_k)
    vmem_limit = int(min(max(32 * 1024 * 1024, 2 * block_io + temps + (4 << 20)),
                         48 * 1024 * 1024))

    out = pl.pallas_call(
        kernel,
        out_shape=jax.ShapeDtypeStruct((B, Sq, D), query.dtype),
        grid_spec=pltpu.PrefetchScalarGridSpec(
            num_scalar_prefetch=0,
            grid=(B, n_q),
            in_specs=[q_spec, kv_spec, kv_spec, mask_spec,
                      w_in_spec, b_in_spec, w_in_spec, b_in_spec,
                      w_in_spec, b_in_spec, wo_spec, bo_spec],
            out_specs=q_spec,
        ),
        compiler_params=pltpu.CompilerParams(
            dimension_semantics=("parallel", "parallel"),
            vmem_limit_bytes=vmem_limit),
        cost_estimate=cost,
    )(query, key, value, mask,
      wq_h, bq_h, wk_h, bk_h, wv_h, bv_h, wo_h, bo)
    return out


def reference_mha(query, key, value, mask, params, *, h):
    """Pure-JAX reference mirroring the PyTorch module forward."""
    B, S, D = query.shape
    d_k = D // h

    def linear(x, w, b):
        return x @ w + b                       # w stored [in, out]

    def split_heads(x):
        return x.reshape(B, -1, h, d_k).transpose(0, 2, 1, 3)

    Q = split_heads(linear(query, params["wq"], params["bq"]))
    K = split_heads(linear(key, params["wk"], params["bk"]))
    V = split_heads(linear(value, params["wv"], params["bv"]))

    scores = jnp.einsum("bhqd,bhkd->bhqk", Q, K) / math.sqrt(d_k)
    scores = jnp.where(mask[:, None, :, :] == 0, -1e9, scores)
    p = jax.nn.softmax(scores, axis=-1)
    out = jnp.einsum("bhqk,bhkd->bhqd", p, V)
    out = out.transpose(0, 2, 1, 3).reshape(B, -1, D)
    return linear(out, params["wo"], params["bo"])


if __name__ == "__main__":
    B, S, d_model, h = 2, 8, 32, 4
    dtype = jnp.float32

    key0 = jax.random.PRNGKey(0)
    keys = jax.random.split(key0, 12)

    def init_linear(kw, kb, fan_in):
        bound = 1.0 / math.sqrt(fan_in)
        w = jax.random.uniform(kw, (d_model, d_model), dtype, -bound, bound)  # [in, out]
        b = jax.random.uniform(kb, (1, d_model), dtype, -bound, bound)
        return w, b

    wq, bq = init_linear(keys[0], keys[1], d_model)
    wk, bk = init_linear(keys[2], keys[3], d_model)
    wv, bv = init_linear(keys[4], keys[5], d_model)
    wo, bo = init_linear(keys[6], keys[7], d_model)
    params = dict(wq=wq, bq=bq, wk=wk, bk=bk, wv=wv, bv=bv, wo=wo, bo=bo)

    query = jax.random.normal(keys[8], (B, S, d_model), dtype)
    k_in = jax.random.normal(keys[9], (B, S, d_model), dtype)
    v_in = jax.random.normal(keys[10], (B, S, d_model), dtype)

    # Causal mask as int8 (4x smaller DMA than f32); all-ones == mask=None.
    causal = jnp.tril(jnp.ones((S, S), dtype=jnp.int8))
    mask = jnp.broadcast_to(causal, (B, S, S))

    out = multi_head_attention(query, k_in, v_in, mask, params, h=h)
    out = jax.block_until_ready(out)

    ref = reference_mha(query, k_in, v_in, mask, params, h=h)
    assert out.shape == (B, S, d_model)
    # Tolerance loosened slightly because the softmax denominator uses the
    # hardware approximate reciprocal (EUP vrcp, ~2^-12 relative error).
    assert jnp.allclose(out, ref, atol=2e-3, rtol=2e-3), (
        "mismatch vs reference: max abs err = %g"
        % float(jnp.max(jnp.abs(out - ref))))

    print("KERNEL_OK")
</pallas_src>

<mosaic_0001>
module attributes {stable_mosaic.version = 11 : i64} {
  func.func @mha_kernel(%arg0: i32, %arg1: i32, %arg2: memref<1x8x32xf32, #tpu.memory_space<vmem>>, %arg3: memref<1x8x32xf32, #tpu.memory_space<vmem>>, %arg4: memref<1x8x32xf32, #tpu.memory_space<vmem>>, %arg5: memref<1x8x8xi8, #tpu.memory_space<vmem>>, %arg6: memref<4x32x8xf32, #tpu.memory_space<vmem>>, %arg7: memref<4x1x8xf32, #tpu.memory_space<vmem>>, %arg8: memref<4x32x8xf32, #tpu.memory_space<vmem>>, %arg9: memref<4x1x8xf32, #tpu.memory_space<vmem>>, %arg10: memref<4x32x8xf32, #tpu.memory_space<vmem>>, %arg11: memref<4x1x8xf32, #tpu.memory_space<vmem>>, %arg12: memref<4x8x32xf32, #tpu.memory_space<vmem>>, %arg13: memref<1x32xf32, #tpu.memory_space<vmem>>, %arg14: memref<1x8x32xf32, #tpu.memory_space<vmem>>) attributes {dimension_semantics = [#tpu.dimension_semantics<parallel>, #tpu.dimension_semantics<parallel>], iteration_bounds = array<i64: 2, 1>, scalar_prefetch = 0 : i64, scratch_operands = 0 : i64, tpu.core_type = #tpu.core_type<tc>, window_params = [{transform_indices = @transform_0, window_bounds = array<i64: 1, 8, 32>}, {transform_indices = @transform_1, window_bounds = array<i64: 1, 8, 32>}, {transform_indices = @transform_2, window_bounds = array<i64: 1, 8, 32>}, {transform_indices = @transform_3, window_bounds = array<i64: 1, 8, 8>}, {pipeline_mode = #tpu.pipeline_mode<synchronous>, transform_indices = @transform_4, window_bounds = array<i64: 4, 32, 8>}, {pipeline_mode = #tpu.pipeline_mode<synchronous>, transform_indices = @transform_5, window_bounds = array<i64: 4, 1, 8>}, {pipeline_mode = #tpu.pipeline_mode<synchronous>, transform_indices = @transform_6, window_bounds = array<i64: 4, 32, 8>}, {pipeline_mode = #tpu.pipeline_mode<synchronous>, transform_indices = @transform_7, window_bounds = array<i64: 4, 1, 8>}, {pipeline_mode = #tpu.pipeline_mode<synchronous>, transform_indices = @transform_8, window_bounds = array<i64: 4, 32, 8>}, {pipeline_mode = #tpu.pipeline_mode<synchronous>, transform_indices = @transform_9, window_bounds = array<i64: 4, 1, 8>}, {pipeline_mode = #tpu.pipeline_mode<synchronous>, transform_indices = @transform_10, window_bounds = array<i64: 4, 8, 32>}, {pipeline_mode = #tpu.pipeline_mode<synchronous>, transform_indices = @transform_11, window_bounds = array<i64: 1, 32>}, {transform_indices = @transform_12, window_bounds = array<i64: 1, 8, 32>}]} {
    %c0 = arith.constant 0 : index
    %c0_0 = arith.constant 0 : index
    %c0_1 = arith.constant 0 : index
    %0 = vector.load %arg2[%c0, %c0_0, %c0_1] : memref<1x8x32xf32, #tpu.memory_space<vmem>>, vector<1x8x32xf32>
    %1 = vector.shape_cast %0 : vector<1x8x32xf32> to vector<8x32xf32>
    %c0_2 = arith.constant 0 : index
    %c0_3 = arith.constant 0 : index
    %c0_4 = arith.constant 0 : index
    %2 = vector.load %arg3[%c0_2, %c0_3, %c0_4] : memref<1x8x32xf32, #tpu.memory_space<vmem>>, vector<1x8x32xf32>
    %3 = vector.shape_cast %2 : vector<1x8x32xf32> to vector<8x32xf32>
    %c0_5 = arith.constant 0 : index
    %c0_6 = arith.constant 0 : index
    %c0_7 = arith.constant 0 : index
    %4 = vector.load %arg4[%c0_5, %c0_6, %c0_7] : memref<1x8x32xf32, #tpu.memory_space<vmem>>, vector<1x8x32xf32>
    %5 = vector.shape_cast %4 : vector<1x8x32xf32> to vector<8x32xf32>
    %c0_8 = arith.constant 0 : index
    %c0_9 = arith.constant 0 : index
    %c0_10 = arith.constant 0 : index
    %6 = vector.load %arg5[%c0_8, %c0_9, %c0_10] : memref<1x8x8xi8, #tpu.memory_space<vmem>>, vector<1x8x8xi8>
    %7 = vector.shape_cast %6 : vector<1x8x8xi8> to vector<8x8xi8>
    %8 = arith.sitofp %7 : vector<8x8xi8> to vector<8x8xf32>
    %cst = arith.constant 0.000000e+00 : f32
    %9 = vector.broadcast %cst : f32 to vector<8x8xf32>
    %10 = arith.cmpf oeq, %8, %9 : vector<8x8xf32>
    %cst_11 = arith.constant 0.000000e+00 : f32
    %11 = vector.broadcast %cst_11 : f32 to vector<8x32xf32>
    %c0_12 = arith.constant 0 : index
    %c0_13 = arith.constant 0 : index
    %c0_14 = arith.constant 0 : index
    %12 = vector.load %arg6[%c0_12, %c0_13, %c0_14] : memref<4x32x8xf32, #tpu.memory_space<vmem>>, vector<1x32x8xf32>
    %13 = vector.shape_cast %12 : vector<1x32x8xf32> to vector<32x8xf32>
    %cst_15 = arith.constant dense<0.000000e+00> : vector<8x8xf32>
    %14 = tpu.matmul %1, %13, %cst_15 {dimension_numbers = #tpu.dot_dimension_numbers<[1], [0], [0], [1], [0, 0, 1, 1], [], []>} : vector<8x32xf32>, vector<32x8xf32>, vector<8x8xf32> -> vector<8x8xf32>
    %c0_16 = arith.constant 0 : index
    %c0_17 = arith.constant 0 : index
    %c0_18 = arith.constant 0 : index
    %15 = vector.load %arg7[%c0_16, %c0_17, %c0_18] : memref<4x1x8xf32, #tpu.memory_space<vmem>>, vector<1x1x8xf32>
    %16 = vector.shape_cast %15 : vector<1x1x8xf32> to vector<1x8xf32>
    %17 = vector.broadcast %16 : vector<1x8xf32> to vector<8x8xf32>
    %18 = arith.addf %14, %17 : vector<8x8xf32>
    %cst_19 = arith.constant 0.353553385 : f32
    %19 = vector.broadcast %cst_19 : f32 to vector<8x8xf32>
    %20 = arith.mulf %18, %19 : vector<8x8xf32>
    %c0_20 = arith.constant 0 : index
    %c0_21 = arith.constant 0 : index
    %c0_22 = arith.constant 0 : index
    %21 = vector.load %arg8[%c0_20, %c0_21, %c0_22] : memref<4x32x8xf32, #tpu.memory_space<vmem>>, vector<1x32x8xf32>
    %22 = vector.shape_cast %21 : vector<1x32x8xf32> to vector<32x8xf32>
    %cst_23 = arith.constant dense<0.000000e+00> : vector<8x8xf32>
    %23 = tpu.matmul %3, %22, %cst_23 {dimension_numbers = #tpu.dot_dimension_numbers<[1], [0], [0], [1], [0, 0, 1, 1], [], []>} : vector<8x32xf32>, vector<32x8xf32>, vector<8x8xf32> -> vector<8x8xf32>
    %c0_24 = arith.constant 0 : index
    %c0_25 = arith.constant 0 : index
    %c0_26 = arith.constant 0 : index
    %24 = vector.load %arg9[%c0_24, %c0_25, %c0_26] : memref<4x1x8xf32, #tpu.memory_space<vmem>>, vector<1x1x8xf32>
    %25 = vector.shape_cast %24 : vector<1x1x8xf32> to vector<1x8xf32>
    %26 = vector.broadcast %25 : vector<1x8xf32> to vector<8x8xf32>
    %27 = arith.addf %23, %26 : vector<8x8xf32>
    %c0_27 = arith.constant 0 : index
    %c0_28 = arith.constant 0 : index
    %c0_29 = arith.constant 0 : index
    %28 = vector.load %arg10[%c0_27, %c0_28, %c0_29] : memref<4x32x8xf32, #tpu.memory_space<vmem>>, vector<1x32x8xf32>
    %29 = vector.shape_cast %28 : vector<1x32x8xf32> to vector<32x8xf32>
    %cst_30 = arith.constant dense<0.000000e+00> : vector<8x8xf32>
    %30 = tpu.matmul %5, %29, %cst_30 {dimension_numbers = #tpu.dot_dimension_numbers<[1], [0], [0], [1], [0, 0, 1, 1], [], []>} : vector<8x32xf32>, vector<32x8xf32>, vector<8x8xf32> -> vector<8x8xf32>
    %c0_31 = arith.constant 0 : index
    %c0_32 = arith.constant 0 : index
    %c0_33 = arith.constant 0 : index
    %31 = vector.load %arg11[%c0_31, %c0_32, %c0_33] : memref<4x1x8xf32, #tpu.memory_space<vmem>>, vector<1x1x8xf32>
    %32 = vector.shape_cast %31 : vector<1x1x8xf32> to vector<1x8xf32>
    %33 = vector.broadcast %32 : vector<1x8xf32> to vector<8x8xf32>
    %34 = arith.addf %30, %33 : vector<8x8xf32>
    %cst_34 = arith.constant dense<0.000000e+00> : vector<8x8xf32>
    %35 = tpu.matmul %20, %27, %cst_34 {dimension_numbers = #tpu.dot_dimension_numbers<[1], [1], [0], [0], [0, 0, 1, 0], [], []>} : vector<8x8xf32>, vector<8x8xf32>, vector<8x8xf32> -> vector<8x8xf32>
    %cst_35 = arith.constant -1.000000e+09 : f32
    %36 = vector.broadcast %cst_35 : f32 to vector<8x8xf32>
    %37 = arith.select %10, %36, %35 : vector<8x8xi1>, vector<8x8xf32>
    %cst_36 = arith.constant dense<0xFF800000> : vector<8xf32>
    %38 = vector.multi_reduction <maximumf>, %37, %cst_36 [1] : vector<8x8xf32> to vector<8xf32>
    %39 = vector.shape_cast %38 : vector<8xf32> to vector<8x1xf32>
    %40 = vector.broadcast %39 : vector<8x1xf32> to vector<8x8xf32>
    %41 = arith.subf %37, %40 : vector<8x8xf32>
    %42 = math.exp %41 : vector<8x8xf32>
    %cst_37 = arith.constant dense<0.000000e+00> : vector<8xf32>
    %43 = vector.multi_reduction <add>, %42, %cst_37 [1] : vector<8x8xf32> to vector<8xf32>
    %44 = vector.shape_cast %43 : vector<8xf32> to vector<8x1xf32>
    %45 = tpu.reciprocal %44 {approx = true} : vector<8x1xf32> -> vector<8x1xf32>
    %46 = vector.broadcast %45 : vector<8x1xf32> to vector<8x8xf32>
    %47 = arith.mulf %42, %46 : vector<8x8xf32>
    %cst_38 = arith.constant dense<0.000000e+00> : vector<8x8xf32>
    %48 = tpu.matmul %47, %34, %cst_38 {dimension_numbers = #tpu.dot_dimension_numbers<[1], [0], [0], [1], [0, 0, 1, 1], [], []>} : vector<8x8xf32>, vector<8x8xf32>, vector<8x8xf32> -> vector<8x8xf32>
    %c0_39 = arith.constant 0 : index
    %c0_40 = arith.constant 0 : index
    %c0_41 = arith.constant 0 : index
    %49 = vector.load %arg12[%c0_39, %c0_40, %c0_41] : memref<4x8x32xf32, #tpu.memory_space<vmem>>, vector<1x8x32xf32>
    %50 = vector.shape_cast %49 : vector<1x8x32xf32> to vector<8x32xf32>
    %cst_42 = arith.constant dense<0.000000e+00> : vector<8x32xf32>
    %51 = tpu.matmul %48, %50, %cst_42 {dimension_numbers = #tpu.dot_dimension_numbers<[1], [0], [0], [1], [0, 0, 1, 1], [], []>} : vector<8x8xf32>, vector<8x32xf32>, vector<8x32xf32> -> vector<8x32xf32>
    %52 = arith.addf %11, %51 : vector<8x32xf32>
    %c1 = arith.constant 1 : index
    %c0_43 = arith.constant 0 : index
    %c0_44 = arith.constant 0 : index
    %53 = vector.load %arg6[%c1, %c0_43, %c0_44] : memref<4x32x8xf32, #tpu.memory_space<vmem>>, vector<1x32x8xf32>
    %54 = vector.shape_cast %53 : vector<1x32x8xf32> to vector<32x8xf32>
    %cst_45 = arith.constant dense<0.000000e+00> : vector<8x8xf32>
    %55 = tpu.matmul %1, %54, %cst_45 {dimension_numbers = #tpu.dot_dimension_numbers<[1], [0], [0], [1], [0, 0, 1, 1], [], []>} : vector<8x32xf32>, vector<32x8xf32>, vector<8x8xf32> -> vector<8x8xf32>
    %c1_46 = arith.constant 1 : index
    %c0_47 = arith.constant 0 : index
    %c0_48 = arith.constant 0 : index
    %56 = vector.load %arg7[%c1_46, %c0_47, %c0_48] : memref<4x1x8xf32, #tpu.memory_space<vmem>>, vector<1x1x8xf32>
    %57 = vector.shape_cast %56 : vector<1x1x8xf32> to vector<1x8xf32>
    %58 = vector.broadcast %57 : vector<1x8xf32> to vector<8x8xf32>
    %59 = arith.addf %55, %58 : vector<8x8xf32>
    %cst_49 = arith.constant 0.353553385 : f32
    %60 = vector.broadcast %cst_49 : f32 to vector<8x8xf32>
    %61 = arith.mulf %59, %60 : vector<8x8xf32>
    %c1_50 = arith.constant 1 : index
    %c0_51 = arith.constant 0 : index
    %c0_52 = arith.constant 0 : index
    %62 = vector.load %arg8[%c1_50, %c0_51, %c0_52] : memref<4x32x8xf32, #tpu.memory_space<vmem>>, vector<1x32x8xf32>
    %63 = vector.shape_cast %62 : vector<1x32x8xf32> to vector<32x8xf32>
    %cst_53 = arith.constant dense<0.000000e+00> : vector<8x8xf32>
    %64 = tpu.matmul %3, %63, %cst_53 {dimension_numbers = #tpu.dot_dimension_numbers<[1], [0], [0], [1], [0, 0, 1, 1], [], []>} : vector<8x32xf32>, vector<32x8xf32>, vector<8x8xf32> -> vector<8x8xf32>
    %c1_54 = arith.constant 1 : index
    %c0_55 = arith.constant 0 : index
    %c0_56 = arith.constant 0 : index
    %65 = vector.load %arg9[%c1_54, %c0_55, %c0_56] : memref<4x1x8xf32, #tpu.memory_space<vmem>>, vector<1x1x8xf32>
    %66 = vector.shape_cast %65 : vector<1x1x8xf32> to vector<1x8xf32>
    %67 = vector.broadcast %66 : vector<1x8xf32> to vector<8x8xf32>
    %68 = arith.addf %64, %67 : vector<8x8xf32>
    %c1_57 = arith.constant 1 : index
    %c0_58 = arith.constant 0 : index
    %c0_59 = arith.constant 0 : index
    %69 = vector.load %arg10[%c1_57, %c0_58, %c0_59] : memref<4x32x8xf32, #tpu.memory_space<vmem>>, vector<1x32x8xf32>
    %70 = vector.shape_cast %69 : vector<1x32x8xf32> to vector<32x8xf32>
    %cst_60 = arith.constant dense<0.000000e+00> : vector<8x8xf32>
    %71 = tpu.matmul %5, %70, %cst_60 {dimension_numbers = #tpu.dot_dimension_numbers<[1], [0], [0], [1], [0, 0, 1, 1], [], []>} : vector<8x32xf32>, vector<32x8xf32>, vector<8x8xf32> -> vector<8x8xf32>
    %c1_61 = arith.constant 1 : index
    %c0_62 = arith.constant 0 : index
    %c0_63 = arith.constant 0 : index
    %72 = vector.load %arg11[%c1_61, %c0_62, %c0_63] : memref<4x1x8xf32, #tpu.memory_space<vmem>>, vector<1x1x8xf32>
    %73 = vector.shape_cast %72 : vector<1x1x8xf32> to vector<1x8xf32>
    %74 = vector.broadcast %73 : vector<1x8xf32> to vector<8x8xf32>
    %75 = arith.addf %71, %74 : vector<8x8xf32>
    %cst_64 = arith.constant dense<0.000000e+00> : vector<8x8xf32>
    %76 = tpu.matmul %61, %68, %cst_64 {dimension_numbers = #tpu.dot_dimension_numbers<[1], [1], [0], [0], [0, 0, 1, 0], [], []>} : vector<8x8xf32>, vector<8x8xf32>, vector<8x8xf32> -> vector<8x8xf32>
    %cst_65 = arith.constant -1.000000e+09 : f32
    %77 = vector.broadcast %cst_65 : f32 to vector<8x8xf32>
    %78 = arith.select %10, %77, %76 : vector<8x8xi1>, vector<8x8xf32>
    %cst_66 = arith.constant dense<0xFF800000> : vector<8xf32>
    %79 = vector.multi_reduction <maximumf>, %78, %cst_66 [1] : vector<8x8xf32> to vector<8xf32>
    %80 = vector.shape_cast %79 : vector<8xf32> to vector<8x1xf32>
    %81 = vector.broadcast %80 : vector<8x1xf32> to vector<8x8xf32>
    %82 = arith.subf %78, %81 : vector<8x8xf32>
    %83 = math.exp %82 : vector<8x8xf32>
    %cst_67 = arith.constant dense<0.000000e+00> : vector<8xf32>
    %84 = vector.multi_reduction <add>, %83, %cst_67 [1] : vector<8x8xf32> to vector<8xf32>
    %85 = vector.shape_cast %84 : vector<8xf32> to vector<8x1xf32>
    %86 = tpu.reciprocal %85 {approx = true} : vector<8x1xf32> -> vector<8x1xf32>
    %87 = vector.broadcast %86 : vector<8x1xf32> to vector<8x8xf32>
    %88 = arith.mulf %83, %87 : vector<8x8xf32>
    %cst_68 = arith.constant dense<0.000000e+00> : vector<8x8xf32>
    %89 = tpu.matmul %88, %75, %cst_68 {dimension_numbers = #tpu.dot_dimension_numbers<[1], [0], [0], [1], [0, 0, 1, 1], [], []>} : vector<8x8xf32>, vector<8x8xf32>, vector<8x8xf32> -> vector<8x8xf32>
    %c1_69 = arith.constant 1 : index
    %c0_70 = arith.constant 0 : index
    %c0_71 = arith.constant 0 : index
    %90 = vector.load %arg12[%c1_69, %c0_70, %c0_71] : memref<4x8x32xf32, #tpu.memory_space<vmem>>, vector<1x8x32xf32>
    %91 = vector.shape_cast %90 : vector<1x8x32xf32> to vector<8x32xf32>
    %cst_72 = arith.constant dense<0.000000e+00> : vector<8x32xf32>
    %92 = tpu.matmul %89, %91, %cst_72 {dimension_numbers = #tpu.dot_dimension_numbers<[1], [0], [0], [1], [0, 0, 1, 1], [], []>} : vector<8x8xf32>, vector<8x32xf32>, vector<8x32xf32> -> vector<8x32xf32>
    %93 = arith.addf %52, %92 : vector<8x32xf32>
    %c2 = arith.constant 2 : index
    %c0_73 = arith.constant 0 : index
    %c0_74 = arith.constant 0 : index
    %94 = vector.load %arg6[%c2, %c0_73, %c0_74] : memref<4x32x8xf32, #tpu.memory_space<vmem>>, vector<1x32x8xf32>
    %95 = vector.shape_cast %94 : vector<1x32x8xf32> to vector<32x8xf32>
    %cst_75 = arith.constant dense<0.000000e+00> : vector<8x8xf32>
    %96 = tpu.matmul %1, %95, %cst_75 {dimension_numbers = #tpu.dot_dimension_numbers<[1], [0], [0], [1], [0, 0, 1, 1], [], []>} : vector<8x32xf32>, vector<32x8xf32>, vector<8x8xf32> -> vector<8x8xf32>
    %c2_76 = arith.constant 2 : index
    %c0_77 = arith.constant 0 : index
    %c0_78 = arith.constant 0 : index
    %97 = vector.load %arg7[%c2_76, %c0_77, %c0_78] : memref<4x1x8xf32, #tpu.memory_space<vmem>>, vector<1x1x8xf32>
    %98 = vector.shape_cast %97 : vector<1x1x8xf32> to vector<1x8xf32>
    %99 = vector.broadcast %98 : vector<1x8xf32> to vector<8x8xf32>
    %100 = arith.addf %96, %99 : vector<8x8xf32>
    %cst_79 = arith.constant 0.353553385 : f32
    %101 = vector.broadcast %cst_79 : f32 to vector<8x8xf32>
    %102 = arith.mulf %100, %101 : vector<8x8xf32>
    %c2_80 = arith.constant 2 : index
    %c0_81 = arith.constant 0 : index
    %c0_82 = arith.constant 0 : index
    %103 = vector.load %arg8[%c2_80, %c0_81, %c0_82] : memref<4x32x8xf32, #tpu.memory_space<vmem>>, vector<1x32x8xf32>
    %104 = vector.shape_cast %103 : vector<1x32x8xf32> to vector<32x8xf32>
    %cst_83 = arith.constant dense<0.000000e+00> : vector<8x8xf32>
    %105 = tpu.matmul %3, %104, %cst_83 {dimension_numbers = #tpu.dot_dimension_numbers<[1], [0], [0], [1], [0, 0, 1, 1], [], []>} : vector<8x32xf32>, vector<32x8xf32>, vector<8x8xf32> -> vector<8x8xf32>
    %c2_84 = arith.constant 2 : index
    %c0_85 = arith.constant 0 : index
    %c0_86 = arith.constant 0 : index
    %106 = vector.load %arg9[%c2_84, %c0_85, %c0_86] : memref<4x1x8xf32, #tpu.memory_space<vmem>>, vector<1x1x8xf32>
    %107 = vector.shape_cast %106 : vector<1x1x8xf32> to vector<1x8xf32>
    %108 = vector.broadcast %107 : vector<1x8xf32> to vector<8x8xf32>
    %109 = arith.addf %105, %108 : vector<8x8xf32>
    %c2_87 = arith.constant 2 : index
    %c0_88 = arith.constant 0 : index
    %c0_89 = arith.constant 0 : index
    %110 = vector.load %arg10[%c2_87, %c0_88, %c0_89] : memref<4x32x8xf32, #tpu.memory_space<vmem>>, vector<1x32x8xf32>
    %111 = vector.shape_cast %110 : vector<1x32x8xf32> to vector<32x8xf32>
    %cst_90 = arith.constant dense<0.000000e+00> : vector<8x8xf32>
    %112 = tpu.matmul %5, %111, %cst_90 {dimension_numbers = #tpu.dot_dimension_numbers<[1], [0], [0], [1], [0, 0, 1, 1], [], []>} : vector<8x32xf32>, vector<32x8xf32>, vector<8x8xf32> -> vector<8x8xf32>
    %c2_91 = arith.constant 2 : index
    %c0_92 = arith.constant 0 : index
    %c0_93 = arith.constant 0 : index
    %113 = vector.load %arg11[%c2_91, %c0_92, %c0_93] : memref<4x1x8xf32, #tpu.memory_space<vmem>>, vector<1x1x8xf32>
    %114 = vector.shape_cast %113 : vector<1x1x8xf32> to vector<1x8xf32>
    %115 = vector.broadcast %114 : vector<1x8xf32> to vector<8x8xf32>
    %116 = arith.addf %112, %115 : vector<8x8xf32>
    %cst_94 = arith.constant dense<0.000000e+00> : vector<8x8xf32>
    %117 = tpu.matmul %102, %109, %cst_94 {dimension_numbers = #tpu.dot_dimension_numbers<[1], [1], [0], [0], [0, 0, 1, 0], [], []>} : vector<8x8xf32>, vector<8x8xf32>, vector<8x8xf32> -> vector<8x8xf32>
    %cst_95 = arith.constant -1.000000e+09 : f32
    %118 = vector.broadcast %cst_95 : f32 to vector<8x8xf32>
    %119 = arith.select %10, %118, %117 : vector<8x8xi1>, vector<8x8xf32>
    %cst_96 = arith.constant dense<0xFF800000> : vector<8xf32>
    %120 = vector.multi_reduction <maximumf>, %119, %cst_96 [1] : vector<8x8xf32> to vector<8xf32>
    %121 = vector.shape_cast %120 : vector<8xf32> to vector<8x1xf32>
    %122 = vector.broadcast %121 : vector<8x1xf32> to vector<8x8xf32>
    %123 = arith.subf %119, %122 : vector<8x8xf32>
    %124 = math.exp %123 : vector<8x8xf32>
    %cst_97 = arith.constant dense<0.000000e+00> : vector<8xf32>
    %125 = vector.multi_reduction <add>, %124, %cst_97 [1] : vector<8x8xf32> to vector<8xf32>
    %126 = vector.shape_cast %125 : vector<8xf32> to vector<8x1xf32>
    %127 = tpu.reciprocal %126 {approx = true} : vector<8x1xf32> -> vector<8x1xf32>
    %128 = vector.broadcast %127 : vector<8x1xf32> to vector<8x8xf32>
    %129 = arith.mulf %124, %128 : vector<8x8xf32>
    %cst_98 = arith.constant dense<0.000000e+00> : vector<8x8xf32>
    %130 = tpu.matmul %129, %116, %cst_98 {dimension_numbers = #tpu.dot_dimension_numbers<[1], [0], [0], [1], [0, 0, 1, 1], [], []>} : vector<8x8xf32>, vector<8x8xf32>, vector<8x8xf32> -> vector<8x8xf32>
    %c2_99 = arith.constant 2 : index
    %c0_100 = arith.constant 0 : index
    %c0_101 = arith.constant 0 : index
    %131 = vector.load %arg12[%c2_99, %c0_100, %c0_101] : memref<4x8x32xf32, #tpu.memory_space<vmem>>, vector<1x8x32xf32>
    %132 = vector.shape_cast %131 : vector<1x8x32xf32> to vector<8x32xf32>
    %cst_102 = arith.constant dense<0.000000e+00> : vector<8x32xf32>
    %133 = tpu.matmul %130, %132, %cst_102 {dimension_numbers = #tpu.dot_dimension_numbers<[1], [0], [0], [1], [0, 0, 1, 1], [], []>} : vector<8x8xf32>, vector<8x32xf32>, vector<8x32xf32> -> vector<8x32xf32>
    %134 = arith.addf %93, %133 : vector<8x32xf32>
    %c3 = arith.constant 3 : index
    %c0_103 = arith.constant 0 : index
    %c0_104 = arith.constant 0 : index
    %135 = vector.load %arg6[%c3, %c0_103, %c0_104] : memref<4x32x8xf32, #tpu.memory_space<vmem>>, vector<1x32x8xf32>
    %136 = vector.shape_cast %135 : vector<1x32x8xf32> to vector<32x8xf32>
    %cst_105 = arith.constant dense<0.000000e+00> : vector<8x8xf32>
    %137 = tpu.matmul %1, %136, %cst_105 {dimension_numbers = #tpu.dot_dimension_numbers<[1], [0], [0], [1], [0, 0, 1, 1], [], []>} : vector<8x32xf32>, vector<32x8xf32>, vector<8x8xf32> -> vector<8x8xf32>
    %c3_106 = arith.constant 3 : index
    %c0_107 = arith.constant 0 : index
    %c0_108 = arith.constant 0 : index
    %138 = vector.load %arg7[%c3_106, %c0_107, %c0_108] : memref<4x1x8xf32, #tpu.memory_space<vmem>>, vector<1x1x8xf32>
    %139 = vector.shape_cast %138 : vector<1x1x8xf32> to vector<1x8xf32>
    %140 = vector.broadcast %139 : vector<1x8xf32> to vector<8x8xf32>
    %141 = arith.addf %137, %140 : vector<8x8xf32>
    %cst_109 = arith.constant 0.353553385 : f32
    %142 = vector.broadcast %cst_109 : f32 to vector<8x8xf32>
    %143 = arith.mulf %141, %142 : vector<8x8xf32>
    %c3_110 = arith.constant 3 : index
    %c0_111 = arith.constant 0 : index
    %c0_112 = arith.constant 0 : index
    %144 = vector.load %arg8[%c3_110, %c0_111, %c0_112] : memref<4x32x8xf32, #tpu.memory_space<vmem>>, vector<1x32x8xf32>
    %145 = vector.shape_cast %144 : vector<1x32x8xf32> to vector<32x8xf32>
    %cst_113 = arith.constant dense<0.000000e+00> : vector<8x8xf32>
    %146 = tpu.matmul %3, %145, %cst_113 {dimension_numbers = #tpu.dot_dimension_numbers<[1], [0], [0], [1], [0, 0, 1, 1], [], []>} : vector<8x32xf32>, vector<32x8xf32>, vector<8x8xf32> -> vector<8x8xf32>
    %c3_114 = arith.constant 3 : index
    %c0_115 = arith.constant 0 : index
    %c0_116 = arith.constant 0 : index
    %147 = vector.load %arg9[%c3_114, %c0_115, %c0_116] : memref<4x1x8xf32, #tpu.memory_space<vmem>>, vector<1x1x8xf32>
    %148 = vector.shape_cast %147 : vector<1x1x8xf32> to vector<1x8xf32>
    %149 = vector.broadcast %148 : vector<1x8xf32> to vector<8x8xf32>
    %150 = arith.addf %146, %149 : vector<8x8xf32>
    %c3_117 = arith.constant 3 : index
    %c0_118 = arith.constant 0 : index
    %c0_119 = arith.constant 0 : index
    %151 = vector.load %arg10[%c3_117, %c0_118, %c0_119] : memref<4x32x8xf32, #tpu.memory_space<vmem>>, vector<1x32x8xf32>
    %152 = vector.shape_cast %151 : vector<1x32x8xf32> to vector<32x8xf32>
    %cst_120 = arith.constant dense<0.000000e+00> : vector<8x8xf32>
    %153 = tpu.matmul %5, %152, %cst_120 {dimension_numbers = #tpu.dot_dimension_numbers<[1], [0], [0], [1], [0, 0, 1, 1], [], []>} : vector<8x32xf32>, vector<32x8xf32>, vector<8x8xf32> -> vector<8x8xf32>
    %c3_121 = arith.constant 3 : index
    %c0_122 = arith.constant 0 : index
    %c0_123 = arith.constant 0 : index
    %154 = vector.load %arg11[%c3_121, %c0_122, %c0_123] : memref<4x1x8xf32, #tpu.memory_space<vmem>>, vector<1x1x8xf32>
    %155 = vector.shape_cast %154 : vector<1x1x8xf32> to vector<1x8xf32>
    %156 = vector.broadcast %155 : vector<1x8xf32> to vector<8x8xf32>
    %157 = arith.addf %153, %156 : vector<8x8xf32>
    %cst_124 = arith.constant dense<0.000000e+00> : vector<8x8xf32>
    %158 = tpu.matmul %143, %150, %cst_124 {dimension_numbers = #tpu.dot_dimension_numbers<[1], [1], [0], [0], [0, 0, 1, 0], [], []>} : vector<8x8xf32>, vector<8x8xf32>, vector<8x8xf32> -> vector<8x8xf32>
    %cst_125 = arith.constant -1.000000e+09 : f32
    %159 = vector.broadcast %cst_125 : f32 to vector<8x8xf32>
    %160 = arith.select %10, %159, %158 : vector<8x8xi1>, vector<8x8xf32>
    %cst_126 = arith.constant dense<0xFF800000> : vector<8xf32>
    %161 = vector.multi_reduction <maximumf>, %160, %cst_126 [1] : vector<8x8xf32> to vector<8xf32>
    %162 = vector.shape_cast %161 : vector<8xf32> to vector<8x1xf32>
    %163 = vector.broadcast %162 : vector<8x1xf32> to vector<8x8xf32>
    %164 = arith.subf %160, %163 : vector<8x8xf32>
    %165 = math.exp %164 : vector<8x8xf32>
    %cst_127 = arith.constant dense<0.000000e+00> : vector<8xf32>
    %166 = vector.multi_reduction <add>, %165, %cst_127 [1] : vector<8x8xf32> to vector<8xf32>
    %167 = vector.shape_cast %166 : vector<8xf32> to vector<8x1xf32>
    %168 = tpu.reciprocal %167 {approx = true} : vector<8x1xf32> -> vector<8x1xf32>
    %169 = vector.broadcast %168 : vector<8x1xf32> to vector<8x8xf32>
    %170 = arith.mulf %165, %169 : vector<8x8xf32>
    %cst_128 = arith.constant dense<0.000000e+00> : vector<8x8xf32>
    %171 = tpu.matmul %170, %157, %cst_128 {dimension_numbers = #tpu.dot_dimension_numbers<[1], [0], [0], [1], [0, 0, 1, 1], [], []>} : vector<8x8xf32>, vector<8x8xf32>, vector<8x8xf32> -> vector<8x8xf32>
    %c3_129 = arith.constant 3 : index
    %c0_130 = arith.constant 0 : index
    %c0_131 = arith.constant 0 : index
    %172 = vector.load %arg12[%c3_129, %c0_130, %c0_131] : memref<4x8x32xf32, #tpu.memory_space<vmem>>, vector<1x8x32xf32>
    %173 = vector.shape_cast %172 : vector<1x8x32xf32> to vector<8x32xf32>
    %cst_132 = arith.constant dense<0.000000e+00> : vector<8x32xf32>
    %174 = tpu.matmul %171, %173, %cst_132 {dimension_numbers = #tpu.dot_dimension_numbers<[1], [0], [0], [1], [0, 0, 1, 1], [], []>} : vector<8x8xf32>, vector<8x32xf32>, vector<8x32xf32> -> vector<8x32xf32>
    %175 = arith.addf %134, %174 : vector<8x32xf32>
    %c0_133 = arith.constant 0 : index
    %c0_134 = arith.constant 0 : index
    %176 = vector.load %arg13[%c0_133, %c0_134] : memref<1x32xf32, #tpu.memory_space<vmem>>, vector<1x32xf32>
    %177 = vector.broadcast %176 : vector<1x32xf32> to vector<8x32xf32>
    %178 = arith.addf %175, %177 : vector<8x32xf32>
    %c0_135 = arith.constant 0 : index
    %c0_136 = arith.constant 0 : index
    %c0_137 = arith.constant 0 : index
    %179 = vector.load %arg14[%c0_135, %c0_136, %c0_137] : memref<1x8x32xf32, #tpu.memory_space<vmem>>, vector<1x8x32xf32>
    %180 = vector.shape_cast %179 : vector<1x8x32xf32> to vector<8x32xf32>
    %181 = vector.shape_cast %178 : vector<8x32xf32> to vector<1x8x32xf32>
    tpu.vector_store %arg14[%c0_135, %c0_136, %c0_137], %181 {strides = array<i32>} : memref<1x8x32xf32, #tpu.memory_space<vmem>>, vector<1x8x32xf32>,
    return
  }
  func.func @transform_0(%arg0: i32, %arg1: i32) -> (i32, i32, i32) {
    %c0_i32 = arith.constant 0 : i32
    %c0_i32_0 = arith.constant 0 : i32
    return %arg0, %arg1, %c0_i32 : i32, i32, i32
  }
  func.func @transform_1(%arg0: i32, %arg1: i32) -> (i32, i32, i32) {
    %c0_i32 = arith.constant 0 : i32
    %c0_i32_0 = arith.constant 0 : i32
    %c0_i32_1 = arith.constant 0 : i32
    return %arg0, %c0_i32, %c0_i32_0 : i32, i32, i32
  }
  func.func @transform_2(%arg0: i32, %arg1: i32) -> (i32, i32, i32) {
    %c0_i32 = arith.constant 0 : i32
    %c0_i32_0 = arith.constant 0 : i32
    %c0_i32_1 = arith.constant 0 : i32
    return %arg0, %c0_i32, %c0_i32_0 : i32, i32, i32
  }
  func.func @transform_3(%arg0: i32, %arg1: i32) -> (i32, i32, i32) {
    %c0_i32 = arith.constant 0 : i32
    %c0_i32_0 = arith.constant 0 : i32
    return %arg0, %arg1, %c0_i32 : i32, i32, i32
  }
  func.func @transform_4(%arg0: i32, %arg1: i32) -> (i32, i32, i32) {
    %c0_i32 = arith.constant 0 : i32
    %c0_i32_0 = arith.constant 0 : i32
    %c0_i32_1 = arith.constant 0 : i32
    %c0_i32_2 = arith.constant 0 : i32
    return %c0_i32, %c0_i32_0, %c0_i32_1 : i32, i32, i32
  }
  func.func @transform_5(%arg0: i32, %arg1: i32) -> (i32, i32, i32) {
    %c0_i32 = arith.constant 0 : i32
    %c0_i32_0 = arith.constant 0 : i32
    %c0_i32_1 = arith.constant 0 : i32
    %c0_i32_2 = arith.constant 0 : i32
    return %c0_i32, %c0_i32_0, %c0_i32_1 : i32, i32, i32
  }
  func.func @transform_6(%arg0: i32, %arg1: i32) -> (i32, i32, i32) {
    %c0_i32 = arith.constant 0 : i32
    %c0_i32_0 = arith.constant 0 : i32
    %c0_i32_1 = arith.constant 0 : i32
    %c0_i32_2 = arith.constant 0 : i32
    return %c0_i32, %c0_i32_0, %c0_i32_1 : i32, i32, i32
  }
  func.func @transform_7(%arg0: i32, %arg1: i32) -> (i32, i32, i32) {
    %c0_i32 = arith.constant 0 : i32
    %c0_i32_0 = arith.constant 0 : i32
    %c0_i32_1 = arith.constant 0 : i32
    %c0_i32_2 = arith.constant 0 : i32
    return %c0_i32, %c0_i32_0, %c0_i32_1 : i32, i32, i32
  }
  func.func @transform_8(%arg0: i32, %arg1: i32) -> (i32, i32, i32) {
    %c0_i32 = arith.constant 0 : i32
    %c0_i32_0 = arith.constant 0 : i32
    %c0_i32_1 = arith.constant 0 : i32
    %c0_i32_2 = arith.constant 0 : i32
    return %c0_i32, %c0_i32_0, %c0_i32_1 : i32, i32, i32
  }
  func.func @transform_9(%arg0: i32, %arg1: i32) -> (i32, i32, i32) {
    %c0_i32 = arith.constant 0 : i32
    %c0_i32_0 = arith.constant 0 : i32
    %c0_i32_1 = arith.constant 0 : i32
    %c0_i32_2 = arith.constant 0 : i32
    return %c0_i32, %c0_i32_0, %c0_i32_1 : i32, i32, i32
  }
  func.func @transform_10(%arg0: i32, %arg1: i32) -> (i32, i32, i32) {
    %c0_i32 = arith.constant 0 : i32
    %c0_i32_0 = arith.constant 0 : i32
    %c0_i32_1 = arith.constant 0 : i32
    %c0_i32_2 = arith.constant 0 : i32
    return %c0_i32, %c0_i32_0, %c0_i32_1 : i32, i32, i32
  }
  func.func @transform_11(%arg0: i32, %arg1: i32) -> (i32, i32) {
    %c0_i32 = arith.constant 0 : i32
    %c0_i32_0 = arith.constant 0 : i32
    %c0_i32_1 = arith.constant 0 : i32
    return %c0_i32, %c0_i32_0 : i32, i32
  }
  func.func @transform_12(%arg0: i32, %arg1: i32) -> (i32, i32, i32) {
    %c0_i32 = arith.constant 0 : i32
    %c0_i32_0 = arith.constant 0 : i32
    return %arg0, %arg1, %c0_i32 : i32, i32, i32
  }
}

</mosaic_0001>

<bundles_post_ra>
// kernel: tpu_custom_call.1
= control target key start
LH: loop header
LB: loop body
LE: loop exit
PB: predicated region body
PF: predicated region fallthrough
CT: control target
= control target key end

     0   :  { %17 = vsyncpa [#allocation3], 0  ;;  %s3677_s0 = inlined_call_operand.vmem [shape: f32[2,8,32], index: 0, kind: input, shape index: {}]   ;;  %s3678_s1 = inlined_call_operand.vmem [shape: f32[2,8,32], index: 1, kind: input, shape index: {}]   ;;  %s3679_s2 = inlined_call_operand.vmem [shape: f32[2,8,32], index: 2, kind: input, shape index: {}]   ;;  %s3680_s3 = inlined_call_operand.vmem [shape: s8[2,8,8], index: 3, kind: input, shape index: {}]   ;;  %s3681_s4 = inlined_call_operand.vmem [shape: f32[4,32,8], index: 4, kind: input, shape index: {}]   ;;  %s3682_s5 = inlined_call_operand.vmem [shape: f32[4,1,8], index: 5, kind: input, shape index: {}]   ;;  %s3683_s6 = inlined_call_operand.vmem [shape: f32[4,32,8], index: 6, kind: input, shape index: {}]   ;;  %s3684_s7 = inlined_call_operand.vmem [shape: f32[4,1,8], index: 7, kind: input, shape index: {}]   ;;  %s3685_s8 = inlined_call_operand.vmem [shape: f32[4,32,8], index: 8, kind: input, shape index: {}]   ;;  %s3686_s9 = inlined_call_operand.vmem [shape: f32[4,1,8], index: 9, kind: input, shape index: {}]   ;;  %s3687_s10 = inlined_call_operand.vmem [shape: f32[4,8,32], index: 10, kind: input, shape index: {}]   ;;  %s3688_s11 = inlined_call_operand.vmem [shape: f32[1,32], index: 11, kind: input, shape index: {}]   ;;  %s3689_s12 = inlined_call_operand.hbm [shape: f32[2,8,32], index: 12, kind: output, shape index: {}]  }
   0x1   :  { %19 = vsyncpa [#allocation3 + $0x1], 0  ;;  %s3185_s21 = smov 0   ;;  %s3187_s22 = smov 0  }
   0x2   :  { %s3189_s23 = smov 0   ;;  %s3191_s24 = smov 0  }
   0x3   :  { %s3193_s25 = smov 0   ;;  %s3195_s26 = smov 0  }
   0x4 LB: > { %3693 = sst [smem:[#allocation5_spill]] %s3103_s23  ;;  %s2587_s27 = sadd.s32 4294967295, %s3115_s26   ;;  %s3115_s26 = sphi %s3195_s26, %s25_s26   ;;  %s3111_s25 = sphi %s3193_s25, %s3702_s25   ;;  %s3107_s24 = sphi %s3191_s24, %s3705_s24   ;;  %s3103_s23 = sphi %s3189_s23, %s3700_s23   ;;  %s3099_s22 = sphi %s3187_s22, %s3704_s22   ;;  %s3095_s21 = sphi %s3185_s21, %s3703_s21  }
   0x5   : > { %3694 = sst [smem:[#allocation6_spill]] %s3111_s25  ;;  %s2588_s28 = sadd.s32 4294967294, %s3115_s26  }
   0x6   : > { %s37_s29 = sadd.s32 1, %s3111_s25  ;;  %s322_s30 = sadd.s32 1, %s3103_s23 }
   0x7   : > { %p39_p0 = scmp.ge.s32.totalorder %s37_s29, 2  ;;  %p332_p1 = scmp.ne.s32.totalorder %s3103_s23, %s3099_s22 }
   0x8   : > { %p333_p2 = scmp.eq.s32.totalorder %s2587_s27, 1  ;;  %p338_p3 = scmp.ne.s32.totalorder %s3099_s22, %s3095_s21 }
   0x9   : > { %s3707_s29 = smov (%p39_p0, %s37_s29), 0  ;;  %p339_p5 = scmp.eq.s32.totalorder %s2588_s28, 1 }
   0xa   : > { %3695 = sst [smem:[#allocation7_spill]] %s3707_s29  ;;  %p3225_p4 = por %p333_p2, %p332_p1 }
   0xb   : > { %s317_s14 = ssub.s32 %s3111_s25, %s3707_s29  ;;  %p2591_p6 = scmp.ge.s32.totalorder %s3115_s26, 1 }
   0xc   : > { %p320_p7 = scmp.eq.s32.totalorder %s317_s14, 0  ;;  %p3232_p8 = por %p339_p5, %p338_p3 }
   0xd   : > { %p415_p9 = scmp.lt.s32.totalorder %s3115_s26, 3 }
   0xe   : > { %s3238_s16 = scalar_select %p320_p7, %s3103_s23, %s322_s30  }
   0xf   : > { %p416_p10 = pnand %p2591_p6, %p415_p9 }
  0x10   : > { %3698 = sst [smem:[#allocation8_spill]] %s3238_s16  ;;  %p474_p11 = scmp.lt.s32.totalorder (!%p416_p10), %s3107_s24, 1 }
  0x11   : > { %419 = sbr.rel (%p416_p10) target bundleno = 3660 (0xe4c), region = 68  ;;  %s3119_s16 = smov (!%p416_p10), [#allocation2]  }
  0x16   : > { %v506_v0 = vld [vmem:[%s3681_s4 + $0x18] sm:$0xff]  ;;  %v3117_v2 = vmov 0.0   ;;  %v505_v3 = vld [vmem:[%s3681_s4 + $0x10] sm:$0xff]  ;;  %s3256_s17 = scalar_select %p474_p11, %s3107_s24, 1  ;;  %v504_v5 = vld [vmem:[%s3681_s4 + $0x8] sm:$0xff]  ;;  %vm514_vm0 = vcmask 261120  }
  0x17   : > { %v592_v1 = vld [vmem:[%s3683_s6 + $0x18] sm:$0xff]  ;;  %2774 = vmatprep.subr.mxu0 %v3117_v2  ;;  %2785 = vmatprep.subr.mxu1 %v3117_v2  ;;  %v591_v4 = vld [vmem:[%s3683_s6 + $0x10] sm:$0xff]  ;;  %v590_v6 = vld [vmem:[%s3683_s6 + $0x8] sm:$0xff]  ;;  %vm3118_vm1 = vmmov 0   ;;  %vm757_vm2 = vcmask 64512  }
  0x18   : > { %2775 = vmatpush3.msra.mxu0 %v506_v0  ;;  %2786 = vmatpush3.msra.mxu1 %v592_v1  ;;  %s3267_s28 = sshll.u32 %s3256_s17, 3  ;;  %v503_v7 = vld [vmem:[%s3681_s4] sm:$0xff]  ;;  %v676_v20 = vld [vmem:[%s3685_s8 + $0x18] sm:$0xff]  ;;  %v675_v21 = vld [vmem:[%s3685_s8 + $0x10] sm:$0xff] }
  0x19   : > { %2776 = vmatprep.subr.mxu0 %v3117_v2  ;;  %2787 = vmatprep.subr.mxu1 %v3117_v2  ;;  %s480_s29 = scalar_lea.vmem %s3677_s0, %s3267_s28  ;;  %s484_s25 = scalar_lea.vmem %s3678_s1, %s3267_s28  ;;  %v589_v8 = vld [vmem:[%s3683_s6] sm:$0xff]  ;;  %v674_v22 = vld [vmem:[%s3685_s8 + $0x8] sm:$0xff]  ;;  %v2609_v39 = vld [vmem:[%s3681_s4 + $0x38] sm:$0xff] }
  0x1a   : > { %2777 = vmatpush3.msra.mxu0 %v505_v3  ;;  %2788 = vmatpush3.msra.mxu1 %v591_v4  ;;  %v3287_v9 = vld [vmem:[%s480_s29] sm:$0xff]  ;;  %s488_s29 = scalar_lea.vmem %s3679_s2, %s3267_s28  ;;  %s2596_s28 = sshll.u32 %s3256_s17, 1  ;;  %v2608_v42 = vld [vmem:[%s3681_s4 + $0x30] sm:$0xff]  ;;  %v2607_v43 = vld [vmem:[%s3681_s4 + $0x28] sm:$0xff] }
  0x1b   : > { %2778 = vmatprep.subr.mxu0 %v3117_v2  ;;  %2789 = vmatprep.subr.mxu1 %v3117_v2  ;;  %v3289_v10 = vld [vmem:[%s484_s25] sm:$0xff]  ;;  %s495_s19 = scalar_lea.vmem %s3680_s3, %s2596_s28  ;;  %v2616_v48 = vld [vmem:[%s3683_s6 + $0x38] sm:$0xff]  ;;  %v2615_v49 = vld [vmem:[%s3683_s6 + $0x30] sm:$0xff]  ;;  %s471_s25 = sand.u32 1, %s3099_s22  }
  0x1c   : > { %2779 = vmatpush3.msra.mxu0 %v504_v5  ;;  %2790 = vmatpush3.msra.mxu1 %v590_v6  ;;  %v2597_v11 = vld [vmem:[%s3682_s5] ss:$0 sm:$0xff]  ;;  %v2614_v50 = vld [vmem:[%s3683_s6 + $0x28] sm:$0xff]  ;;  %v2611_v56 = vld [vmem:[%s3682_s5 + $0x1] ss:$0 sm:$0xff]  ;;  %s2687_s28 = sshll.u32 %s3107_s24, 7 }
  0x1d   : > { %2780 = vmatprep.subr.mxu0 %v3117_v2  ;;  %2791 = vmatprep.subr.mxu1 %v3117_v2  ;;  %v2599_v12 = vld [vmem:[%s3684_s7] ss:$0 sm:$0xff]  ;;  %v2618_v58 = vld [vmem:[%s3684_s7 + $0x1] ss:$0 sm:$0xff]  ;;  %v2623_v63 = vld [vmem:[%s3685_s8 + $0x38] sm:$0xff]  ;;  %s2475_s20 = scalar_lea.hbm %s3689_s12, %s2687_s28  ;;  %s2463_s27 = scalar_lea.sflag [#allocation3], %s471_s25 }
  0x1e   : > { %2781 = vmatpush3.msra.mxu0 %v503_v7  ;;  %2782 = vmatprep.mubr.msk.f32.mxu0 %vm3118_vm1, %v3117_v2  ;;  %v673_v23 = vld [vmem:[%s3685_s8] sm:$0xff]  ;;  %v2622_v0 = vld [vmem:[%s3685_s8 + $0x30] sm:$0xff]  ;;  %v2621_v1 = vld [vmem:[%s3685_s8 + $0x28] sm:$0xff]  ;;  %s3043_s24 = sshll.u32 %s3119_s16, 4  ;;  %s3044_s24 = int_to_ptr.vmem [resolvable:$false] %s3043_s24 }
  0x1f   : > { %2792 = vmatpush3.msra.mxu1 %v589_v8  ;;  %2793 = vmatprep.mubr.msk.f32.mxu1 %vm3118_vm1, %v3117_v2  ;;  %v3334_v24 = vld [vmem:[%s488_s29] sm:$0xff]  ;;  %s2592_s29 = sshll.u32 %s471_s25, 3 }
  0x20   : > { %2783 = vmatmul.mubr.msk.f32.vlgmr.msra.gmra.mxu0 %vm514_vm0, %v3287_v9  ;;  %2794 = vmatmul.mubr.msk.f32.vlgmr.msra.gmra.mxu1 %vm514_vm0, %v3289_v10  ;;  %v499_v25 = vld [vmem:[%s495_s19] sm:$0x3]  ;;  %s473_s14 = scalar_lea.vmem [#allocation2], %s2592_s29  ;;  %s3045_s29 = scalar_lea.vmem %s3044_s24, 256 }
  0x21   : > { %2807 = vmatprep.subr.mxu1 %v3117_v2  ;;  %2809 = vmatprep.mubr.msk.f32.mxu1 %vm3118_vm1, %v3117_v2  ;;  %v500_v26 = vunpack.c.0.s8 %v499_v25  ;;  %v2601_v37 = vld [vmem:[%s3686_s9] ss:$0 sm:$0xff]  ;;  %v2643_v25 = vld [vmem:[%s3683_s6 + $0x58] sm:$0xff]  ;;  %s2477_s18 = sshll.u32 %s473_s14, 4  ;;  %s2478_s18 = int_to_ptr.vmem [resolvable:$true] %s2477_s18 }
  0x22   : > { %2796 = vmatprep.subr.mxu0 %v3117_v2  ;;  %2804 = vmatprep.mubr.msk.f32.mxu0 %vm3118_vm1, %v3117_v2  ;;  %v2606_v44 = vld [vmem:[%s3681_s4 + $0x20] sm:$0xff]  ;;  %s3039_s23 = scalar_lea.vmem %s2478_s18, 128  ;;  %p3046_p1 = scmp.lt.s32.totalorder %s2478_s18, %s3044_s24 }
  0x23   : > { %2797 = vmatpush3.msra.mxu0 %v676_v20  ;;  %v3346_v27 = vcvt.s32.f32 %v500_v26  ;;  %v2613_v51 = vld [vmem:[%s3683_s6 + $0x20] sm:$0xff]  ;;  %v2642_v26 = vld [vmem:[%s3683_s6 + $0x50] sm:$0xff]  ;;  %p3040_p12 = scmp.ne.s32.totalorder %s2478_s18, %s3039_s23  ;;  %p3047_p2 = scmp.lt.s32.totalorder %s3045_s29, %s3039_s23 }
  0x24   : > { %2798 = vmatprep.subr.mxu0 %v3117_v2  ;;  %v2620_v3 = vld [vmem:[%s3685_s8 + $0x20] sm:$0xff] }
  0x25   : > { %2799 = vmatpush3.msra.mxu0 %v675_v21  ;;  %vm502_vm3 = vcmp.eq.f32.partialorder %v3346_v27, 0.0  ;;  %p3041_p13 = pnand %p3040_p12, %p3225_p4  ;;  %p3048_p3 = por %p3047_p2, %p3046_p1 }
  0x26   : > { %2800 = vmatprep.subr.mxu0 %v3117_v2 }
  0x27   : > { %2801 = vmatpush3.msra.mxu0 %v674_v22  ;;  %p3042_p0 = pneg %p3041_p13 }
  0x28   : > { %2802 = vmatprep.subr.mxu0 %v3117_v2 }
  0x29   : > { %2803 = vmatpush3.msra.mxu0 %v673_v23  ;;  %v919_v23 = vld [vmem:[%s3687_s10] sm:$0xff]  ;;  %p3049_p5 = pnand %p3048_p3, %p3042_p0 }
  0x2a   : > { %2805 = vmatmul.mubr.msk.f32.vlgmr.msra.gmra.mxu0 %vm514_vm0, %v3334_v24  ;;  %2817 = vmatprep.subr.mxu0 %v3117_v2 }
  0x2b   : > { %2825 = vmatprep.mubr.msk.f32.mxu0 %vm3118_vm1, %v3117_v2  ;;  %2818 = vmatpush3.msra.mxu0 %v2609_v39 }
  0x2c   : > { %2819 = vmatprep.subr.mxu0 %v3117_v2 }
  0x2d   : > { %2820 = vmatpush3.msra.mxu0 %v2608_v42 }
  0x2e   : > { %2821 = vmatprep.subr.mxu0 %v3117_v2 }
  0x2f   : > { %2822 = vmatpush3.msra.mxu0 %v2607_v43 }
  0x30   : > { %2823 = vmatprep.subr.mxu0 %v3117_v2 }
  0x31   : > { %2824 = vmatpush3.msra.mxu0 %v2606_v44  ;;  %v2638_v44 = vld [vmem:[%s3682_s5 + $0x2] ss:$0 sm:$0xff] }
  0x32   : > { %2826 = vmatmul.mubr.msk.f32.vlgmr.msra.gmra.mxu0 %vm514_vm0, %v3287_v9  ;;  %2839 = vmatprep.subr.mxu0 %v3117_v2 }
  0x33   : > { %2847 = vmatprep.mubr.msk.f32.mxu0 %vm3118_vm1, %v3117_v2  ;;  %2840 = vmatpush3.msra.mxu0 %v2623_v63 }
  0x34   : > { %2841 = vmatprep.subr.mxu0 %v3117_v2 }
  0x35   : > { %2842 = vmatpush3.msra.mxu0 %v2622_v0 }
  0x36   : > { %2843 = vmatprep.subr.mxu0 %v3117_v2 }
  0x37   : > { %2844 = vmatpush3.msra.mxu0 %v2621_v1 }
  0x38   : > { %2845 = vmatprep.subr.mxu0 %v3117_v2 }
  0x39   : > { %2846 = vmatpush3.msra.mxu0 %v2620_v3  ;;  %v2657_v3 = vld [vmem:[%s3687_s10 + $0x10] sm:$0xff] }
  0x3a   : > { %2848 = vmatmul.mubr.msk.f32.vlgmr.msra.gmra.mxu0 %vm514_vm0, %v3334_v24  ;;  %2860 = vmatprep.subr.mxu0 %v3117_v2 }
  0x3b   : > { %2862 = vmatprep.mubr.msk.f32.mxu0 %vm3118_vm1, %v3117_v2 }
  0xe0   : > { %v584_v13 = vpop.f32.mrf.mxu0  ;;  %v669_v14 = vpop.f32.mrf.mxu1 }
  0xe1   : > { %v585_v15 = vadd.f32 %v2597_v11, %v584_v13  ;;  %v670_v16 = vadd.f32 %v2599_v12, %v669_v14 }
  0xe2   : > { %v2784_v17 = vpop.f32.mrf.mxu0  ;;  %v2795_v18 = vpop.f32.mrf.mxu1 }
  0xe3   : > { %v588_v19 = vmul.f32 0.35355338, %v585_v15  ;;  %2808 = vmatpush3.xpose.msk.msra.mxu1 %vm757_vm2, %v670_v16  ;;  %v2625_v15 = vld [vmem:[%s3686_s9 + $0x1] ss:$0 sm:$0xff] }
  0xe4   : > { %2812 = vmatprep.subr.mxu1 %v3117_v2 }
  0xe6   : > { %2810 = vmatmul.mubr.msk.f32.vlgmr.msra.gmra.mxu1 %vm757_vm2, %v588_v19  ;;  %v2630_v19 = vld [vmem:[%s3687_s10 + $0x8] sm:$0xff] }
  0xe7   : > { %2814 = vmatprep.mubr.msk.f32.mxu1 %vm3118_vm1, %v3117_v2  ;;  %2861 = vmatpush3.msra.mxu0 %v2630_v19 }
  0xe8   : > { %2870 = vmatprep.subr.mxu0 %v3117_v2 }
  0xea   : > { %v753_v38 = vpop.f32.mrf.mxu0 }
  0xeb   : > { %v754_v40 = vadd.f32 %v2601_v37, %v753_v38  ;;  %v2645_v38 = vld [vmem:[%s3684_s7 + $0x2] ss:$0 sm:$0xff] }
  0xec   : > { %v2806_v41 = vpop.f32.mrf.mxu0 }
  0xed   : > { %2813 = vmatpush3.msra.mxu1 %v754_v40 }
  0xee   : > { %2828 = vmatprep.subr.mxu1 %v3117_v2 }
  0xf2   : > { %v999_v52 = vpop.f32.mrf.mxu0 }
  0xf3   : > { %v1000_v57 = vadd.f32 %v2611_v56, %v999_v52  ;;  %v2647_v52 = vld [vmem:[%s3685_s8 + $0x40] sm:$0xff] }
  0xf4   : > { %v2827_v53 = vpop.f32.mrf.mxu0 }
  0xf5   : > { %v1003_v61 = vmul.f32 0.35355338, %v1000_v57 }
  0xfa   : > { %v1166_v16 = vpop.f32.mrf.mxu0 }
  0xfb   : > { %v1167_v17 = vadd.f32 %v2625_v15, %v1166_v16  ;;  %v2668_v15 = vld [vmem:[%s3683_s6 + $0x70] sm:$0xff] }
  0xfc   : > { %v2849_v18 = vpop.f32.mrf.mxu0 }
 0x1a6   : > { %v830_v28 = vpop.f32.mrf.mxu1 }
 0x1a7   : > { %v834_v29 = vsel %vm502_vm3, -1e+09, %v830_v28  ;;  %v2641_v28 = vld [vmem:[%s3683_s6 + $0x48] sm:$0xff] }
 0x1a8   : > { %v2811_v30 = vpop.f32.mrf.mxu1  ;;  %v835_v31 = vsel %vm757_vm2, %v834_v29, -inf }
 0x1a9   : > { %836 = vmax.xlane.f32.xlu0 %v835_v31  ;;  %v2636_v30 = vld [vmem:[%s3681_s4 + $0x58] sm:$0xff] }
 0x232   : > { %v837_v32 = vpop.xlane.xlu0 %836 }
 0x233   : > { %v838_v33 = vsub.f32 %v834_v29, %v837_v32  ;;  %v2640_v29 = vld [vmem:[%s3683_s6 + $0x40] sm:$0xff]  ;;  %v2635_v32 = vld [vmem:[%s3681_s4 + $0x50] sm:$0xff] }
 0x235   : > { %v839_v34 = vmul.f32 1.442695, %v838_v33 }
 0x237   : > { %3023 = vpow2.f32 %v839_v34  ;;  %v2634_v34 = vld [vmem:[%s3681_s4 + $0x48] sm:$0xff] }
 0x244   : > { %v3024_v35 = vpop.eup %3023 }
 0x245   : > { %v841_v36 = vsel %vm757_vm2, %v3024_v35, 0.0 }
 0x246   : > { %842 = vadd.xlane.f32.xlu0 %v841_v36  ;;  %v2633_v36 = vld [vmem:[%s3681_s4 + $0x40] sm:$0xff] }
 0x2cf   : > { %v843_v45 = vpop.xlane.xlu0 %842 }
 0x2d0   : > { %3025 = vrcp.f32 %v843_v45 }
 0x2dd   : > { %v3026_v46 = vpop.eup %3025 }
 0x2de   : > { %v845_v47 = vmul.f32 %v3026_v46, %v3024_v35 }
 0x2e0   : > { %2815 = vmatmul.mubr.msk.f32.vlgmr.msra.gmra.mxu1 %vm757_vm2, %v845_v47 }
 0x2e1   : > { %2829 = vmatpush3.msra.mxu1 %v2616_v48  ;;  %2836 = vmatprep.mubr.msk.f32.mxu1 %vm3118_vm1, %v3117_v2 }
 0x2e2   : > { %2830 = vmatprep.subr.mxu1 %v3117_v2 }
 0x2e3   : > { %2831 = vmatpush3.msra.mxu1 %v2615_v49  ;;  %v2650_v49 = vld [vmem:[%s3685_s8 + $0x58] sm:$0xff] }
 0x2e4   : > { %2832 = vmatprep.subr.mxu1 %v3117_v2 }
 0x2e5   : > { %2833 = vmatpush3.msra.mxu1 %v2614_v50  ;;  %v2649_v50 = vld [vmem:[%s3685_s8 + $0x50] sm:$0xff] }
 0x2e6   : > { %2834 = vmatprep.subr.mxu1 %v3117_v2 }
 0x2e7   : > { %2835 = vmatpush3.msra.mxu1 %v2613_v51  ;;  %v2648_v51 = vld [vmem:[%s3685_s8 + $0x48] sm:$0xff] }
 0x2e8   : > { %2837 = vmatmul.mubr.msk.f32.vlgmr.msra.gmra.mxu1 %vm514_vm0, %v3289_v10  ;;  %2850 = vmatprep.subr.mxu1 %v3117_v2 }
 0x2e9   : > { %2852 = vmatprep.mubr.msk.f32.mxu1 %vm3118_vm1, %v3117_v2 }
 0x3a0   : > { %v915_v54 = vpop.f32.mrf.mxu1 }
 0x3a2   : > { %v2816_v55 = vpop.f32.mrf.mxu1 }
 0x3a8   : > { %v1083_v59 = vpop.f32.mrf.mxu1 }
 0x3a9   : > { %v1084_v60 = vadd.f32 %v2618_v58, %v1083_v59 }
 0x3aa   : > { %v2838_v62 = vpop.f32.mrf.mxu1 }
 0x3ab   : > { %2851 = vmatpush3.xpose.msk.msra.mxu1 %vm757_vm2, %v1084_v60  ;;  %v2652_v62 = vld [vmem:[%s3686_s9 + $0x2] ss:$0 sm:$0xff] }
 0x3ac   : > { %2855 = vmatprep.subr.mxu1 %v3117_v2 }
 0x3ae   : > { %2853 = vmatmul.mubr.msk.f32.vlgmr.msra.gmra.mxu1 %vm757_vm2, %v1003_v61 }
 0x3af   : > { %2857 = vmatprep.mubr.msk.f32.mxu1 %vm3118_vm1, %v3117_v2  ;;  %2856 = vmatpush3.msra.mxu1 %v1167_v17  ;;  %v2666_v17 = vld [vmem:[%s3683_s6 + $0x60] sm:$0xff] }
 0x3b0   : > { %2865 = vmatprep.subr.mxu1 %v3117_v2 }
 0x46e   : > { %v1242_v4 = vpop.f32.mrf.mxu1 }
 0x46f   : > { %v1246_v5 = vsel %vm502_vm3, -1e+09, %v1242_v4 }
 0x470   : > { %v2854_v6 = vpop.f32.mrf.mxu1  ;;  %v1247_v7 = vsel %vm757_vm2, %v1246_v5, -inf }
 0x471   : > { %1248 = vmax.xlane.f32.xlu1 %v1247_v7  ;;  %v2662_v7 = vld [vmem:[%s3681_s4 + $0x78] sm:$0xff] }
 0x4fa   : > { %v1249_v8 = vpop.xlane.xlu1 %1248 }
 0x4fb   : > { %v1250_v11 = vsub.f32 %v1246_v5, %v1249_v8  ;;  %v2661_v8 = vld [vmem:[%s3681_s4 + $0x70] sm:$0xff] }
 0x4fd   : > { %v1251_v12 = vmul.f32 1.442695, %v1250_v11  ;;  %v2660_v11 = vld [vmem:[%s3681_s4 + $0x68] sm:$0xff] }
 0x4ff   : > { %3027 = vpow2.f32 %v1251_v12  ;;  %v2659_v12 = vld [vmem:[%s3681_s4 + $0x60] sm:$0xff] }
 0x50c   : > { %v3028_v13 = vpop.eup %3027 }
 0x50d   : > { %v1253_v14 = vsel %vm757_vm2, %v3028_v13, 0.0 }
 0x50e   : > { %1254 = vadd.xlane.f32.xlu1 %v1253_v14 }
 0x597   : > { %v1255_v20 = vpop.xlane.xlu1 %1254 }
 0x598   : > { %3029 = vrcp.f32 %v1255_v20 }
 0x5a5   : > { %v3030_v21 = vpop.eup %3029 }
 0x5a6   : > { %v1257_v22 = vmul.f32 %v3030_v21, %v3028_v13  ;;  %v2669_v13 = vld [vmem:[%s3683_s6 + $0x78] sm:$0xff] }
 0x5a8   : > { %2858 = vmatmul.mubr.msk.f32.vlgmr.msra.gmra.mxu1 %vm757_vm2, %v1257_v22 }
 0x5a9   : > { %2866 = vmatpush3.msra.mxu1 %v919_v23  ;;  %2867 = vmatprep.mubr.msk.f32.mxu1 %vm3118_vm1, %v3117_v2 }
 0x5aa   : > { %2881 = vmatprep.subr.mxu1 %v3117_v2 }
 0x5ac   : > { %2868 = vmatmul.mubr.msk.f32.vlgmr.msra.gmra.mxu1 %vm757_vm2, %v915_v54 }
 0x5ad   : > { %2882 = vmatpush3.msra.mxu1 %v2643_v25  ;;  %2889 = vmatprep.mubr.msk.f32.mxu1 %vm3118_vm1, %v3117_v2  ;;  %v2664_v25 = vld [vmem:[%s3682_s5 + $0x3] ss:$0 sm:$0xff] }
 0x5ae   : > { %2883 = vmatprep.subr.mxu1 %v3117_v2 }
 0x5af   : > { %2884 = vmatpush3.msra.mxu1 %v2642_v26 }
 0x5b0   : > { %2885 = vmatprep.subr.mxu1 %v3117_v2 }
 0x5b1   : > { %2886 = vmatpush3.msra.mxu1 %v2641_v28 }
 0x5b2   : > { %2887 = vmatprep.subr.mxu1 %v3117_v2 }
 0x5b3   : > { %2888 = vmatpush3.msra.mxu1 %v2640_v29 }
 0x5b4   : > { %2890 = vmatmul.mubr.msk.f32.vlgmr.msra.gmra.mxu1 %vm514_vm0, %v3289_v10  ;;  %2903 = vmatprep.subr.mxu1 %v3117_v2 }
 0x5b5   : > { %2905 = vmatprep.mubr.msk.f32.mxu1 %vm3118_vm1, %v3117_v2 }
 0x668   : > { %v1327_v31 = vpop.f32.mrf.mxu1 }
 0x669   : > { %2863 = vmatmul.mubr.msk.f32.vlgmr.msra.gmra.mxu0 %vm757_vm2, %v1327_v31 }
 0x66a   : > { %2871 = vmatpush3.msra.mxu0 %v2636_v30  ;;  %v2859_v33 = vpop.f32.mrf.mxu1  ;;  %2878 = vmatprep.mubr.msk.f32.mxu0 %vm3118_vm1, %v3117_v2 }
 0x66b   : > { %2872 = vmatprep.subr.mxu0 %v3117_v2  ;;  %v2675_v33 = vld [vmem:[%s3685_s8 + $0x70] sm:$0xff] }
 0x66c   : > { %2873 = vmatpush3.msra.mxu0 %v2635_v32  ;;  %v3486_v35 = vpop.f32.mrf.mxu1  ;;  %v2676_v32 = vld [vmem:[%s3685_s8 + $0x78] sm:$0xff] }
 0x66d   : > { %2874 = vmatprep.subr.mxu0 %v3117_v2 }
 0x66e   : > { %2875 = vmatpush3.msra.mxu0 %v2634_v34  ;;  %v2869_v37 = vpop.f32.mrf.mxu1  ;;  %v2674_v34 = vld [vmem:[%s3685_s8 + $0x68] sm:$0xff] }
 0x66f   : > { %2876 = vmatprep.subr.mxu0 %v3117_v2 }
 0x670   : > { %2877 = vmatpush3.msra.mxu0 %v2633_v36 }
 0x671   : > { %2879 = vmatmul.mubr.msk.f32.vlgmr.msra.gmra.mxu0 %vm514_vm0, %v3287_v9  ;;  %2892 = vmatprep.subr.mxu0 %v3117_v2 }
 0x672   : > { %2900 = vmatprep.mubr.msk.f32.mxu0 %vm3118_vm1, %v3117_v2  ;;  %2893 = vmatpush3.msra.mxu0 %v2650_v49 }
 0x673   : > { %2894 = vmatprep.subr.mxu0 %v3117_v2 }
 0x674   : > { %v1642_v39 = vpop.f32.mrf.mxu1  ;;  %2895 = vmatpush3.msra.mxu0 %v2649_v50 }
 0x675   : > { %v1643_v40 = vadd.f32 %v2645_v38, %v1642_v39  ;;  %2896 = vmatprep.subr.mxu0 %v3117_v2 }
 0x676   : > { %v2891_v41 = vpop.f32.mrf.mxu1  ;;  %2897 = vmatpush3.msra.mxu0 %v2648_v51 }
 0x677   : > { %2904 = vmatpush3.xpose.msk.msra.mxu1 %vm757_vm2, %v1643_v40  ;;  %2898 = vmatprep.subr.mxu0 %v3117_v2 }
 0x678   : > { %2908 = vmatprep.subr.mxu1 %v3117_v2  ;;  %2899 = vmatpush3.msra.mxu0 %v2647_v52 }
 0x679   : > { %2901 = vmatmul.mubr.msk.f32.vlgmr.msra.gmra.mxu0 %vm514_vm0, %v3334_v24  ;;  %2913 = vmatprep.subr.mxu0 %v3117_v2 }
 0x67a   : > { %2915 = vmatprep.mubr.msk.f32.mxu0 %vm3118_vm1, %v3117_v2  ;;  %2914 = vmatpush3.msra.mxu0 %v2657_v3 }
 0x67b   : > { %2929 = vmatprep.subr.mxu0 %v3117_v2 }
 0x729   : > { %v3503_v42 = vpop.f32.mrf.mxu0 }
 0x72a   : > { %v1476_v20 = vadd.f32 %v3486_v35, %v3503_v42  ;;  %v2673_v35 = vld [vmem:[%s3685_s8 + $0x60] sm:$0xff] }
 0x72b   : > { %v2864_v43 = vpop.f32.mrf.mxu0 }
 0x731   : > { %v1558_v45 = vpop.f32.mrf.mxu0 }
 0x732   : > { %v1559_v46 = vadd.f32 %v2638_v44, %v1558_v45 }
 0x733   : > { %v2880_v47 = vpop.f32.mrf.mxu0 }
 0x734   : > { %v1562_v48 = vmul.f32 0.35355338, %v1559_v46  ;;  %v2683_v46 = vld [vmem:[%s3687_s10 + $0x18] sm:$0xff] }
 0x736   : > { %2906 = vmatmul.mubr.msk.f32.vlgmr.msra.gmra.mxu1 %vm757_vm2, %v1562_v48 }
 0x737   : > { %2910 = vmatprep.mubr.msk.f32.mxu1 %vm3118_vm1, %v3117_v2 }
 0x739   : > { %v1725_v63 = vpop.f32.mrf.mxu0 }
 0x73a   : > { %v1726_v0 = vadd.f32 %v2652_v62, %v1725_v63 }
 0x73b   : > { %v2902_v1 = vpop.f32.mrf.mxu0 }
 0x73c   : > { %2909 = vmatpush3.msra.mxu1 %v1726_v0 }
 0x73d   : > { %2918 = vmatprep.subr.mxu1 %v3117_v2 }
 0x7f6   : > { %v1801_v53 = vpop.f32.mrf.mxu1 }
 0x7f7   : > { %v1805_v54 = vsel %vm502_vm3, -1e+09, %v1801_v53  ;;  %v2685_v53 = vld [vmem:[%s3688_s11] ss:$0 sm:$0xff] }
 0x7f8   : > { %v2907_v55 = vpop.f32.mrf.mxu1  ;;  %v1806_v56 = vsel %vm757_vm2, %v1805_v54, -inf }
 0x7f9   : > { %1807 = vmax.xlane.f32.xlu0 %v1806_v56 }
 0x882   : > { %v1808_v57 = vpop.xlane.xlu0 %1807 }
 0x883   : > { %v1809_v58 = vsub.f32 %v1805_v54, %v1808_v57 }
 0x885   : > { %v1810_v59 = vmul.f32 1.442695, %v1809_v58 }
 0x887   : > { %3031 = vpow2.f32 %v1810_v59 }
 0x894   : > { %v3032_v60 = vpop.eup %3031 }
 0x895   : > { %v1812_v61 = vsel %vm757_vm2, %v3032_v60, 0.0 }
 0x896   : > { %1813 = vadd.xlane.f32.xlu1 %v1812_v61 }
 0x91f   : > { %v1814_v4 = vpop.xlane.xlu1 %1813 }
 0x920   : > { %3033 = vrcp.f32 %v1814_v4 }
 0x92d   : > { %v3034_v5 = vpop.eup %3033 }
 0x92e   : > { %v1816_v6 = vmul.f32 %v3034_v5, %v3032_v60 }
 0x930   : > { %2911 = vmatmul.mubr.msk.f32.vlgmr.msra.gmra.mxu1 %vm757_vm2, %v1816_v6 }
 0x931   : > { %2926 = vmatprep.mubr.msk.f32.mxu1 %vm3118_vm1, %v3117_v2  ;;  %2919 = vmatpush3.msra.mxu1 %v2662_v7 }
 0x932   : > { %2920 = vmatprep.subr.mxu1 %v3117_v2 }
 0x933   : > { %2921 = vmatpush3.msra.mxu1 %v2661_v8 }
 0x934   : > { %2922 = vmatprep.subr.mxu1 %v3117_v2 }
 0x935   : > { %2923 = vmatpush3.msra.mxu1 %v2660_v11 }
 0x936   : > { %2924 = vmatprep.subr.mxu1 %v3117_v2 }
 0x937   : > { %2925 = vmatpush3.msra.mxu1 %v2659_v12 }
 0x938   : > { %2927 = vmatmul.mubr.msk.f32.vlgmr.msra.gmra.mxu1 %vm514_vm0, %v3287_v9  ;;  %2940 = vmatprep.subr.mxu1 %v3117_v2  ;;  %v2667_v9 = vld [vmem:[%s3683_s6 + $0x68] sm:$0xff] }
 0x939   : > { %2948 = vmatprep.mubr.msk.f32.mxu1 %vm3118_vm1, %v3117_v2  ;;  %2941 = vmatpush3.msra.mxu1 %v2676_v32 }
 0x93a   : > { %2942 = vmatprep.subr.mxu1 %v3117_v2 }
 0x93b   : > { %2943 = vmatpush3.msra.mxu1 %v2675_v33 }
 0x93c   : > { %2944 = vmatprep.subr.mxu1 %v3117_v2 }
 0x93d   : > { %2945 = vmatpush3.msra.mxu1 %v2674_v34 }
 0x93e   : > { %2946 = vmatprep.subr.mxu1 %v3117_v2 }
 0x93f   : > { %2947 = vmatpush3.msra.mxu1 %v2673_v35 }
 0x940   : > { %2949 = vmatmul.mubr.msk.f32.vlgmr.msra.gmra.mxu1 %vm514_vm0, %v3334_v24  ;;  %2961 = vmatprep.subr.mxu1 %v3117_v2 }
 0x941   : > { %2963 = vmatprep.mubr.msk.f32.mxu1 %vm3118_vm1, %v3117_v2  ;;  %2962 = vmatpush3.msra.mxu1 %v2683_v46 }
 0x9f0   : > { %v1886_v14 = vpop.f32.mrf.mxu1 }
 0x9f1   : > { %2916 = vmatmul.mubr.msk.f32.vlgmr.msra.gmra.mxu0 %vm757_vm2, %v1886_v14 }
 0x9f2   : > { %2930 = vmatpush3.msra.mxu0 %v2669_v13  ;;  %v2912_v16 = vpop.f32.mrf.mxu1  ;;  %2937 = vmatprep.mubr.msk.f32.mxu0 %vm3118_vm1, %v3117_v2 }
 0x9f3   : > { %2931 = vmatprep.subr.mxu0 %v3117_v2 }
 0x9f4   : > { %2932 = vmatpush3.msra.mxu0 %v2668_v15 }
 0x9f5   : > { %2933 = vmatprep.subr.mxu0 %v3117_v2 }
 0x9f6   : > { %2934 = vmatpush3.msra.mxu0 %v2667_v9 }
 0x9f7   : > { %2935 = vmatprep.subr.mxu0 %v3117_v2 }
 0x9f8   : > { %2936 = vmatpush3.msra.mxu0 %v2666_v17  ;;  %v2045_v18 = vpop.f32.mrf.mxu1 }
 0x9f9   : > { %2938 = vmatmul.mubr.msk.f32.vlgmr.msra.gmra.mxu0 %vm514_vm0, %v3289_v10  ;;  %2951 = vmatprep.subr.mxu0 %v3117_v2  ;;  %v2046_v26 = vadd.f32 %v2664_v25, %v2045_v18  ;;  %v2671_v10 = vld [vmem:[%s3684_s7 + $0x3] ss:$0 sm:$0xff] }
 0x9fa   : > { %2953 = vmatprep.mubr.msk.f32.mxu0 %vm3118_vm1, %v3117_v2  ;;  %v2928_v19 = vpop.f32.mrf.mxu1 }
 0x9fb   : > { %v2049_v30 = vmul.f32 0.35355338, %v2046_v26 }
 0xa00   : > { %v2212_v44 = vpop.f32.mrf.mxu1 }
 0xa02   : > { %v2950_v45 = vpop.f32.mrf.mxu1 }
 0xab1   : > { %v1961_v21 = vpop.f32.mrf.mxu0 }
 0xab2   : > { %v1965_v22 = vadd.f32 %v1961_v21, %v1476_v20 }
 0xab3   : > { %v2917_v23 = vpop.f32.mrf.mxu0 }
 0xab9   : > { %v2129_v28 = vpop.f32.mrf.mxu0 }
 0xaba   : > { %v2130_v29 = vadd.f32 %v2671_v10, %v2129_v28 }
 0xabb   : > { %v2939_v31 = vpop.f32.mrf.mxu0 }
 0xabc   : > { %2952 = vmatpush3.xpose.msk.msra.mxu0 %vm757_vm2, %v2130_v29 }
 0xabd   : > { %2956 = vmatprep.subr.mxu0 %v3117_v2 }
 0xabf   : > { %2954 = vmatmul.mubr.msk.f32.vlgmr.msra.gmra.mxu0 %vm757_vm2, %v2049_v30 }
 0xac0   : > { %2958 = vmatprep.mubr.msk.f32.mxu0 %vm3118_vm1, %v3117_v2  ;;  %v2678_v2 = vld [vmem:[%s3686_s9 + $0x3] ss:$0 sm:$0xff] }
 0xac1   : > { %v2213_v27 = vadd.f32 %v2678_v2, %v2212_v44 }
 0xac3   : > { %2957 = vmatpush3.msra.mxu0 %v2213_v27 }
 0xb7f   : > { %v2288_v36 = vpop.f32.mrf.mxu0 }
 0xb80   : > { %v2292_v37 = vsel %vm502_vm3, -1e+09, %v2288_v36 }
 0xb81   : > { %v2955_v38 = vpop.f32.mrf.mxu0  ;;  %v2293_v39 = vsel %vm757_vm2, %v2292_v37, -inf }
 0xb82   : > { %2294 = vmax.xlane.f32.xlu0 %v2293_v39 }
 0xc0b   : > { %v2295_v40 = vpop.xlane.xlu0 %2294 }
 0xc0c   : > { %v2296_v41 = vsub.f32 %v2292_v37, %v2295_v40 }
 0xc0e   : > { %v2297_v42 = vmul.f32 1.442695, %v2296_v41 }
 0xc10   : > { %3035 = vpow2.f32 %v2297_v42 }
 0xc1d   : > { %v3036_v43 = vpop.eup %3035 }
 0xc1e   : > { %v2299_v24 = vsel %vm757_vm2, %v3036_v43, 0.0 }
 0xc1f   : > { %2300 = vadd.xlane.f32.xlu1 %v2299_v24 }
 0xca8   : > { %v2301_v47 = vpop.xlane.xlu1 %2300 }
 0xca9   : > { %3037 = vrcp.f32 %v2301_v47 }
 0xcb6   : > { %v3038_v48 = vpop.eup %3037 }
 0xcb7   : > { %v2303_v49 = vmul.f32 %v3038_v48, %v3036_v43 }
 0xcb9   : > { %2959 = vmatmul.mubr.msk.f32.vlgmr.msra.gmra.mxu0 %vm757_vm2, %v2303_v49 }
 0xd79   : > { %v2373_v50 = vpop.f32.mrf.mxu0 }
 0xd7a   : > { %2964 = vmatmul.mubr.msk.f32.vlgmr.msra.gmra.mxu1 %vm757_vm2, %v2373_v50 }
 0xd7b   : > { %v2960_v51 = vpop.f32.mrf.mxu0 }
 0xe3a   : > { %v2448_v52 = vpop.f32.mrf.mxu1 }
 0xe3b   : > { %v2452_v54 = vadd.f32 %v2448_v52, %v1965_v22 }
 0xe3c   : > { %v2965_v55 = vpop.f32.mrf.mxu1 }
 0xe3d   : > { %v2460_v56 = vadd.f32 %v2685_v53, %v2452_v54 }
 0xe3f   : > { %2461 = vst.msk [vmem:[%s473_s14] sm:$0xff] %vm514_vm0, %v2460_v56 }
 0xe40   : > { %3052 = shalt.err (!%p3049_p5)
}
 0xe41   : > { %s3053_s30 = scalar_lea.hbm %s2475_s20, 128  ;;  %s3057_s14 = scalar_lea.hbm %s3689_s12, 256 }
 0xe42   : > { %p3054_p6 = scmp.ne.s32.totalorder %s2475_s20, %s3053_s30  ;;  %p3058_p10 = scmp.lt.s32.totalorder %s2475_s20, %s3689_s12 }
 0xe43   : > { %p3059_p11 = scmp.lt.s32.totalorder %s3057_s14, %s3053_s30 }
 0xe44   : > { %p3055_p7 = pnand %p3054_p6, %p3225_p4 }
 0xe45   : > { %p3060_p12 = por %p3059_p11, %p3058_p10 }
 0xe46   : > { %p3056_p9 = pneg %p3055_p7 }
 0xe48   : > { %p3061_p13 = pnand %p3060_p12, %p3056_p9 }
 0xe4a   : > { %3064 = shalt.err (!%p3061_p13)
}
 0xe4b   : > { %2966 = dma.vmem_to_hbm [thread:$0]  (%p3225_p4), %s2478_s18, 128, %s2475_s20, %s2463_s27  }
 0xe4c PF: > { %p2972_p0 = scmp.ge.s32.totalorder %s3115_s26, 2  ;;  %s2489_s23 = sand.u32 1, %s3095_s21  }
 0xe4d   : > { %s2490_s16 = scalar_lea.sflag [#allocation3], %s2489_s23 }
 0xe4e   : > { %p2969_p1 = pnand %p2972_p0, %p3232_p8 }
 0xe50   : > { %p2970_p2 = pneg %p2969_p1 }
 0xe52   : > { %3090 = dma.done.wait (%p2970_p2), %s2490_s16, 128  }
 0xe53   : > { %3092 = vsyncadd (%p2970_p2), %s2490_s16, 4294967168  ;;  %s25_s26 = sadd.s32 1, %s3115_s26   ;;  %s3699_s24 = sld [smem:[#allocation5_spill]] }
 0xe54   : > { %p22_p3 = scmp.ge.s32.totalorder %s25_s26, 4   ;;  %s3700_s23 = sld [smem:[#allocation8_spill]] }
 0xe55   : > { %s3701_s13 = sld [smem:[#allocation6_spill]]  ;;  %s3703_s21 = smov %s3099_s22 }
 0xe56   : > { %s3702_s25 = sld [smem:[#allocation7_spill]] }
 0xe57   :  { %24 = sbr.rel (!%p22_p3) target bundleno = 4 (0x4), region = 133 }
 0xe59   : > { %s3704_s22 = smov %s3699_s24 }
 0xe5b   : > { %s3705_s24 = smov %s3701_s13 }
 0xe5c   :  { %2495 = vsyncpa [#allocation3], 1 }
 0xe5d   :  { %2497 = vsyncpa [#allocation3 + $0x1], 1 }

</bundles_post_ra>
